<compile_context>
chip_gen: v5e
topology: v5e:2x2
jax: 0.10.0
libtpu: 0.0.40
codegen_flags: <defaults>
</compile_context>

<pallas_src>
import functools

import jax
import jax.numpy as jnp
from jax.experimental import pallas as pl
from jax.experimental.pallas import tpu as pltpu

_LANE = 128
_MAX_WIDTH = 8192


def _gaussian_kernel(x_ref, o_ref, *, mu: float, neg_inv_two_sigma_sq: float):
    # Upcast to f32 for the square/exp (free under HBM-bound roofline), cast
    # back to the output dtype on the store.
    x = x_ref[...].astype(jnp.float32)
    d = x - mu
    o_ref[...] = jnp.exp((d * d) * neg_inv_two_sigma_sq).astype(o_ref.dtype)


def _choose_width(n_aligned: int) -> int:
    """Largest multiple of 128 (capped at 8192) that divides n_aligned."""
    best = _LANE
    w = _LANE
    limit = min(_MAX_WIDTH, n_aligned)
    while w <= limit:
        if n_aligned % w == 0:
            best = w
        w += _LANE
    return best


def _default_block_bytes() -> int:
    """Generation-gated block size; stays inside every scoped-VMEM default."""
    try:
        kind = jax.devices()[0].device_kind.lower()
    except Exception:
        return 2 << 20
    if "v7" in kind:
        return 6 << 20   # 24 MiB double-buffered < 32 MiB scoped default, 64 MiB VMEM
    if "v6" in kind:
        return 4 << 20   # 16 MiB double-buffered < 32 MiB scoped default
    return 2 << 20       # v5e (16 MiB scoped default) and anything unknown


def gaussian_kernel(x: jax.Array, mu: float = 1.0, sigma: float = 1.0,
                    *, target_block_bytes: int | None = None) -> jax.Array:
    """Elementwise exp(-(x-mu)^2 / (2 sigma^2)) via a Pallas TPU kernel."""
    orig_shape = x.shape
    orig_dtype = x.dtype
    n = x.size
    itemsize = jnp.dtype(orig_dtype).itemsize

    mu_f = float(mu)
    neg_inv = -1.0 / (2.0 * float(sigma) ** 2)

    x_flat = jnp.reshape(x, (-1,))

    # 128-aligned prefix goes through Pallas copy-free; the (<128-element)
    # remainder is handled with plain jnp.  Common case: rem == 0.
    n_aligned = n - (n % _LANE)
    rem = n - n_aligned

    if n_aligned == 0:
        # Tiny (<128-element) input: a Pallas launch is pure overhead.
        xf = x_flat.astype(jnp.float32)
        y = jnp.exp(((xf - mu_f) ** 2) * neg_inv).astype(orig_dtype)
        return jnp.reshape(y, orig_shape)

    if target_block_bytes is None:
        target_block_bytes = _default_block_bytes()

    W = _choose_width(n_aligned)
    rows = n_aligned // W
    prefix = x_flat if rem == 0 else x_flat[:n_aligned]
    x2d = jnp.reshape(prefix, (rows, W))

    # Sublane packing per dtype: 8 rows for 4-byte, 16 for 2-byte, 32 for 1-byte.
    sublane = max(8, 32 // itemsize)
    tile_rows = max(sublane, target_block_bytes // (W * itemsize))
    tile_rows = (tile_rows // sublane) * sublane
    if tile_rows >= rows:
        tile_rows = rows  # single block: first dim equals full array dim -> valid

    # v7x has 2 TensorCores: give multi-MiB inputs at least 2 grid steps so
    # the "parallel" axis can be sharded across both cores.
    total_bytes = n_aligned * itemsize
    if total_bytes > (4 << 20) and -(-rows // tile_rows) < 2:
        half = -(-rows // 2)
        tile_rows = ((half + sublane - 1) // sublane) * sublane

    grid = (pl.cdiv(rows, tile_rows),)  # ragged row tail is masked by Pallas

    kern = functools.partial(
        _gaussian_kernel, mu=mu_f, neg_inv_two_sigma_sq=neg_inv)

    out2d = pl.pallas_call(
        kern,
        out_shape=jax.ShapeDtypeStruct((rows, W), orig_dtype),
        grid_spec=pltpu.PrefetchScalarGridSpec(
            num_scalar_prefetch=0,
            grid=grid,
            in_specs=[pl.BlockSpec((tile_rows, W), lambda i: (i, 0))],
            out_specs=pl.BlockSpec((tile_rows, W), lambda i: (i, 0)),
        ),
        compiler_params=pltpu.CompilerParams(
            dimension_semantics=("parallel",)),
        cost_estimate=pl.CostEstimate(
            flops=3 * n_aligned,
            transcendentals=n_aligned,
            bytes_accessed=2 * n_aligned * itemsize),
    )(x2d)

    if rem == 0:
        return jnp.reshape(out2d, orig_shape)

    # Ragged tail (<128 elements): plain jnp, appended to the Pallas prefix.
    tail = x_flat[n_aligned:].astype(jnp.float32)
    tail_out = jnp.exp(((tail - mu_f) ** 2) * neg_inv).astype(orig_dtype)
    out_flat = jnp.concatenate([jnp.reshape(out2d, (-1,)), tail_out])
    return jnp.reshape(out_flat, orig_shape)


if __name__ == "__main__":
    key = jax.random.PRNGKey(0)
    mu, sigma = 1.0, 1.0

    # Small NCHW-style input (128-divisible path: no pad, no slice).
    x = jax.random.normal(key, (2, 4, 16, 16), dtype=jnp.float32)
    y = jax.block_until_ready(gaussian_kernel(x, mu=mu, sigma=sigma))
    y_ref = jnp.exp(-jnp.power(x - mu, 2) / (2.0 * sigma ** 2))
    assert y.shape == x.shape and y.dtype == x.dtype
    assert jnp.allclose(y, y_ref, atol=1e-6, rtol=1e-6)

    # Ragged path: n not divisible by 128 -> Pallas prefix + jnp tail.
    x2 = jax.random.normal(jax.random.PRNGKey(1), (3, 5, 17, 19),
                           dtype=jnp.float32)
    y2 = jax.block_until_ready(gaussian_kernel(x2, mu=0.5, sigma=2.0))
    y2_ref = jnp.exp(-jnp.power(x2 - 0.5, 2) / (2.0 * 2.0 ** 2))
    assert y2.shape == x2.shape and y2.dtype == x2.dtype
    assert jnp.allclose(y2, y2_ref, atol=1e-6, rtol=1e-6)

    # bf16 input: kernel computes in f32 internally, casts on the store.
    x3 = jax.random.normal(jax.random.PRNGKey(2), (4, 8, 32),
                           dtype=jnp.bfloat16)
    y3 = jax.block_until_ready(gaussian_kernel(x3, mu=mu, sigma=sigma))
    y3_ref = jnp.exp(-(x3.astype(jnp.float32) - mu) ** 2
                     / (2.0 * sigma ** 2)).astype(jnp.bfloat16)
    assert y3.shape == x3.shape and y3.dtype == x3.dtype
    assert jnp.allclose(y3.astype(jnp.float32), y3_ref.astype(jnp.float32),
                        atol=2e-2, rtol=0)

    print("KERNEL_OK")
</pallas_src>

<mosaic_0001>
module attributes {stable_mosaic.version = 11 : i64} {
  func.func @_gaussian_kernel(%arg0: i32, %arg1: memref<1x2048xf32, #tpu.memory_space<vmem>>, %arg2: memref<1x2048xf32, #tpu.memory_space<vmem>>) attributes {dimension_semantics = [#tpu.dimension_semantics<parallel>], iteration_bounds = array<i64: 1>, scalar_prefetch = 0 : i64, scratch_operands = 0 : i64, tpu.core_type = #tpu.core_type<tc>, window_params = [{transform_indices = @transform_0, window_bounds = array<i64: 1, 2048>}, {transform_indices = @transform_1, window_bounds = array<i64: 1, 2048>}]} {
    %c0 = arith.constant 0 : index
    %c0_0 = arith.constant 0 : index
    %0 = vector.load %arg1[%c0, %c0_0] : memref<1x2048xf32, #tpu.memory_space<vmem>>, vector<1x2048xf32>
    %cst = arith.constant 1.000000e+00 : f32
    %1 = vector.broadcast %cst : f32 to vector<1x2048xf32>
    %2 = arith.subf %0, %1 : vector<1x2048xf32>
    %3 = arith.mulf %2, %2 : vector<1x2048xf32>
    %cst_1 = arith.constant -5.000000e-01 : f32
    %4 = vector.broadcast %cst_1 : f32 to vector<1x2048xf32>
    %5 = arith.mulf %3, %4 : vector<1x2048xf32>
    %6 = math.exp %5 : vector<1x2048xf32>
    %c0_2 = arith.constant 0 : index
    %c0_3 = arith.constant 0 : index
    %7 = vector.load %arg2[%c0_2, %c0_3] : memref<1x2048xf32, #tpu.memory_space<vmem>>, vector<1x2048xf32>
    tpu.vector_store %arg2[%c0_2, %c0_3], %6 {strides = array<i32>} : memref<1x2048xf32, #tpu.memory_space<vmem>>, vector<1x2048xf32>,
    return
  }
  func.func @transform_0(%arg0: i32) -> (i32, i32) {
    %c0_i32 = arith.constant 0 : i32
    %c0_i32_0 = arith.constant 0 : i32
    return %arg0, %c0_i32 : i32, i32
  }
  func.func @transform_1(%arg0: i32) -> (i32, i32) {
    %c0_i32 = arith.constant 0 : i32
    %c0_i32_0 = arith.constant 0 : i32
    return %arg0, %c0_i32 : i32, i32
  }
}

</mosaic_0001>

<bundles_post_ra>
// kernel: tpu_custom_call.1
= control target key start
LH: loop header
LB: loop body
LE: loop exit
PB: predicated region body
PF: predicated region fallthrough
CT: control target
= control target key end

     0   :  { %6 = vsyncpa [#allocation3], 0  ;;  %s132_s0 = inlined_call_operand.hbm [shape: f32[1,2048], index: 0, kind: input, shape index: {}]   ;;  %s133_s1 = inlined_call_operand.hbm [shape: f32[1,2048], index: 1, kind: output, shape index: {}]  }
   0x1   :  { %7 = vsyncpa [#allocation4], 0  ;;  %s13_s8 = sshll.u32 %s132_s0, 4  ;;  %s114_s9 = smov [#allocation2]   ;;  %s14_s8 = int_to_ptr.hbm [resolvable:$true] %s13_s8 }
   0x2   :  { %s15_s10 = sshll.u32 %s114_s9, 4  ;;  %s16_s10 = int_to_ptr.vmem [resolvable:$true] %s15_s10 }
   0x3   :  { %18 = dma.hbm_to_vmem [thread:$0]  %s14_s8, 256, %s16_s10, [#allocation3]  }
   0x4   :  { %110 = dma.done.wait [#allocation3], 256  }
   0x5   :  { %111 = vsyncadd [#allocation3], 4294967040  ;;  %v23_v0 = vld [vmem:[#allocation2] sm:$0xff]  ;;  %v24_v1 = vld [vmem:[#allocation2 + $0x8] sm:$0xff]  ;;  %s115_s0 = smov [#allocation5]   ;;  %s44_s14 = sshll.u32 %s133_s1, 4  ;;  %s45_s14 = int_to_ptr.hbm [resolvable:$true] %s44_s14 }
   0x6   :  { %v54_v2 = vadd.f32 -1.0, %v23_v0  ;;  %v55_v3 = vadd.f32 -1.0, %v24_v1  ;;  %s42_s11 = sshll.u32 %s115_s0, 4  ;;  %s43_s11 = int_to_ptr.vmem [resolvable:$true] %s42_s11 }
   0x8   :  { %v27_v4 = vmul.f32 %v54_v2, %v54_v2  ;;  %v28_v5 = vmul.f32 %v55_v3, %v55_v3 }
   0xa   :  { %v29_v6 = vmul.f32 -0.5, %v27_v4  ;;  %v30_v7 = vmul.f32 -0.5, %v28_v5 }
   0xc   :  { %v31_v8 = vmul.f32 1.442695, %v29_v6  ;;  %v33_v9 = vmul.f32 1.442695, %v30_v7 }
   0xe   :  { %58 = vpow2.f32 %v31_v8 }
   0xf   :  { %60 = vpow2.f32 %v33_v9 }
  0x14   :  { %v59_v10 = vpop.eup %58 }
  0x15   :  { %v61_v11 = vpop.eup %60  ;;  %35 = vst [vmem:[#allocation5] sm:$0xff] %v59_v10 }
  0x16   :  { %36 = vst [vmem:[#allocation5 + $0x8] sm:$0xff] %v61_v11 }
  0x17   :  { %47 = dma.vmem_to_hbm [thread:$0]  %s43_s11, 256, %s45_s14, [#allocation4]  }
  0x18   :  { %112 = dma.done.wait [#allocation4], 256  }
  0x19   :  { %113 = vsyncadd [#allocation4], 4294967040 }
  0x1a   :  { %52 = vsyncpa [#allocation3], 1 }
  0x1b   :  { %53 = vsyncpa [#allocation4], 1 }

</bundles_post_ra>
